<compile_context>
chip_gen: v5e
topology: v5e:2x2
jax: 0.10.0
libtpu: 0.0.40
codegen_flags: <defaults>
</compile_context>

<pallas_src>
import functools

import jax
import jax.numpy as jnp
from jax.experimental import pallas as pl
from jax.experimental.pallas import tpu as pltpu


# ----------------------------------------------------------------------------
# Fused kernel body: projection + mask + normalize + MaxSim for one batch block
# ----------------------------------------------------------------------------
def _colbert_body(hq_ref, hd_ref, w_ref, ids_ref, attn_ref, o_ref, *,
                  bb, lq, ld, metric):
    dim = w_ref.shape[-1]
    w = w_ref[...]                                        # bf16, VMEM-resident

    # ---- projection: two (rows,768)@(768,dim) MXU matmuls, f32 accumulation --
    eq = jnp.dot(hq_ref[...], w, preferred_element_type=jnp.float32)  # (bb*lq, dim)
    ed = jnp.dot(hd_ref[...], w, preferred_element_type=jnp.float32)  # (bb*ld, dim)

    # ---- fused L2 normalize (rsqrt on the EUP; zero rows stay exactly 0) -----
    eq = eq * jax.lax.rsqrt(jnp.maximum(jnp.sum(eq * eq, -1, keepdims=True), 1e-24))
    ed = ed * jax.lax.rsqrt(jnp.maximum(jnp.sum(ed * ed, -1, keepdims=True), 1e-24))

    q = eq.reshape(bb, lq, dim)                           # normalized queries
    d = ed.reshape(bb, ld, dim)                           # normalized docs (unmasked)

    # ---- MaxSim score --------------------------------------------------------
    qk = jnp.einsum('bqd,bkd->bqk', q, d,
                    preferred_element_type=jnp.float32)   # (bb, lq, ld)
    tokf = (ids_ref[...] != 0).astype(jnp.float32)        # (bb, 1, ld)

    if metric == 'cosine':
        # masking D before normalization == scaling sims by the 0/1 token mask
        s = qk * tokf
    else:
        # -||q-d||^2 = 2*m*qk - (1 + m): q rows are unit norm; d rows are unit
        # norm where m==1 and exactly zero where m==0.
        s = 2.0 * qk * tokf - (1.0 + tokf)
        s = jnp.where(attn_ref[...] != 0, s, -100000.0)

    best = jnp.max(s, axis=2)                             # (bb, lq)
    tot = jnp.sum(best, axis=1, keepdims=True)            # (bb, 1)
    o_ref[...] = jnp.broadcast_to(tot[:, :, None],
                                  o_ref.shape).astype(o_ref.dtype)


def _colbert_kernel_cosine(hq_ref, hd_ref, w_ref, ids_ref, o_ref, *, bb, lq, ld):
    _colbert_body(hq_ref, hd_ref, w_ref, ids_ref, None, o_ref,
                  bb=bb, lq=lq, ld=ld, metric='cosine')


def _colbert_kernel_l2(hq_ref, hd_ref, w_ref, ids_ref, attn_ref, o_ref, *,
                       bb, lq, ld):
    _colbert_body(hq_ref, hd_ref, w_ref, ids_ref, attn_ref, o_ref,
                  bb=bb, lq=lq, ld=ld, metric='l2')


# ----------------------------------------------------------------------------
# Block sizing: ~3 MB of bf16 hidden bytes per grid step, sublane-aligned
# ----------------------------------------------------------------------------
def _pick_batch_block(B, Lq, Ld, H):
    bytes_per_batch = (Lq + Ld) * H * 2                   # bf16 hidden bytes
    bb = max(1, (3 << 20) // bytes_per_batch)             # target ~3 MB / step
    if B >= 4:
        bb = min(bb, max(1, B // 4))                      # keep >= 4 grid steps
    bb = min(bb, B)
    # keep the 2D hidden blocks sublane-aligned for bf16 (16-row pack)
    while (bb * Lq) % 16 or (bb * Ld) % 16:
        bb += 1
    return int(bb)


# ----------------------------------------------------------------------------
# Wrapper
# ----------------------------------------------------------------------------
def colbert_forward(hidden_q, hidden_d, W, doc_input_ids, doc_attn_mask,
                    similarity_metric, *, batch_block=None):
    """Full ColBERT.forward (post-BERT): query(), doc(), score(), fused."""
    assert similarity_metric in ('cosine', 'l2')
    B, Lq, H = hidden_q.shape
    _, Ld, _ = hidden_d.shape
    dim = W.shape[1]

    bb = batch_block if batch_block is not None else _pick_batch_block(B, Lq, Ld, H)

    grid_n = int(pl.cdiv(B, bb))
    if grid_n > 1 and grid_n % 2:
        grid_n += 1                       # even step count -> balanced v7x TCs
    Bp = grid_n * bb

    # bf16 MXU inputs (no-op casts when the producer already emits bf16).
    hidden_q = hidden_q.astype(jnp.bfloat16)
    hidden_d = hidden_d.astype(jnp.bfloat16)
    w_bf16 = W.astype(jnp.bfloat16)       # tiny; stays VMEM-resident in-kernel
    doc_input_ids = doc_input_ids.astype(jnp.int32)
    doc_attn_mask = doc_attn_mask.astype(jnp.int32)

    # Pad batch up to grid*bb (padded rows produce garbage scores, sliced off).
    if Bp != B:
        pad = Bp - B
        hidden_q = jnp.pad(hidden_q, ((0, pad), (0, 0), (0, 0)))
        hidden_d = jnp.pad(hidden_d, ((0, pad), (0, 0), (0, 0)))
        doc_input_ids = jnp.pad(doc_input_ids, ((0, pad), (0, 0)))
        doc_attn_mask = jnp.pad(doc_attn_mask, ((0, pad), (0, 0)))

    # 2D-flattened activations -> cleanly tiled row blocks, no in-kernel 3D->2D.
    hq2d = hidden_q.reshape(Bp * Lq, H)
    hd2d = hidden_d.reshape(Bp * Ld, H)
    ids3 = doc_input_ids.reshape(Bp, 1, Ld)               # lane-dense int operand

    in_specs = [
        pl.BlockSpec((bb * Lq, H), lambda g: (g, 0)),
        pl.BlockSpec((bb * Ld, H), lambda g: (g, 0)),
        pl.BlockSpec((H, dim), lambda g: (0, 0)),          # W: VMEM-resident
        pl.BlockSpec((bb, 1, Ld), lambda g: (g, 0, 0)),
    ]
    operands = [hq2d, hd2d, w_bf16, ids3]
    if similarity_metric == 'l2':
        in_specs.append(pl.BlockSpec((bb, 1, Ld), lambda g: (g, 0, 0)))
        operands.append(doc_attn_mask.reshape(Bp, 1, Ld))
        kernel = functools.partial(_colbert_kernel_l2, bb=bb, lq=Lq, ld=Ld)
    else:
        # doc_attn_mask is dead in the cosine path -> never DMA'd.
        kernel = functools.partial(_colbert_kernel_cosine, bb=bb, lq=Lq, ld=Ld)

    # VMEM budget from actual block sizes (double-buffered inputs + temporaries),
    # clamped to fit v7x's 64 MiB physical VMEM, lifting v5e's 16 MiB default.
    hq_blk = bb * Lq * H * 2
    hd_blk = bb * Ld * H * 2
    w_blk = H * dim * 2
    small = bb * (2 * Ld + 128) * 4
    temps = 3 * bb * (Lq + Ld) * dim * 4 + 2 * bb * Lq * Ld * 4
    est = 2 * (hq_blk + hd_blk + small) + 2 * w_blk + temps + (2 << 20)
    vmem_limit = int(min(max(est, 16 << 20), 40 << 20))

    out = pl.pallas_call(
        kernel,
        out_shape=jax.ShapeDtypeStruct((Bp, 1, 128), jnp.float32),
        grid=(grid_n,),
        in_specs=in_specs,
        out_specs=pl.BlockSpec((bb, 1, 128), lambda g: (g, 0, 0)),
        compiler_params=pltpu.CompilerParams(
            dimension_semantics=("parallel",),
            vmem_limit_bytes=vmem_limit),
    )(*operands)
    return out[:B, 0, 0]


# ----------------------------------------------------------------------------
# Pure-JAX reference (torch semantics) for validation
# ----------------------------------------------------------------------------
def ref_forward(hidden_q, hidden_d, W, doc_input_ids, doc_attn_mask, metric):
    Q = hidden_q @ W
    Q = Q / jnp.maximum(jnp.linalg.norm(Q, axis=-1, keepdims=True), 1e-12)
    D = (hidden_d @ W) * (doc_input_ids != 0).astype(jnp.float32)[..., None]
    D = D / jnp.maximum(jnp.linalg.norm(D, axis=-1, keepdims=True), 1e-12)
    if metric == 'cosine':
        s = jnp.einsum('bqd,bkd->bqk', Q, D)
        return jnp.max(s, axis=2).sum(axis=1)
    s = -jnp.sum((Q[:, :, None, :] - D[:, None, :, :]) ** 2, axis=-1)
    s = jnp.where(doc_attn_mask[:, None, :].astype(bool), s, -100000.0)
    return jnp.max(s, axis=2).sum(axis=1)


# ----------------------------------------------------------------------------
# Main
# ----------------------------------------------------------------------------
if __name__ == "__main__":
    B, Lq, Ld, H, DIM = 2, 8, 16, 768, 128

    key = jax.random.PRNGKey(0)
    k1, k2, k3, k4 = jax.random.split(key, 4)

    # Synthetic BERT hidden states, emitted as bf16 by the "encoder" (producer).
    hidden_q = jax.random.normal(k1, (B, Lq, H), dtype=jnp.float32).astype(jnp.bfloat16)
    hidden_d = jax.random.normal(k2, (B, Ld, H), dtype=jnp.float32).astype(jnp.bfloat16)
    # nn.Linear(768, dim, bias=False) weight, stored as [768, dim].
    W = 0.02 * jax.random.normal(k3, (H, DIM), dtype=jnp.float32)

    # Synthetic doc token ids with trailing padding (id 0).
    doc_input_ids = jax.random.randint(k4, (B, Ld), 1, 30, dtype=jnp.int32)
    doc_input_ids = doc_input_ids.at[:, Ld - 4:].set(0)
    doc_attn_mask = (doc_input_ids != 0).astype(jnp.int32)

    # Reference computed in f32 on the exact bf16 inputs the kernel consumes.
    hq_f32 = hidden_q.astype(jnp.float32)
    hd_f32 = hidden_d.astype(jnp.float32)
    w_f32 = W.astype(jnp.bfloat16).astype(jnp.float32)

    ok = True
    for metric in ('cosine', 'l2'):
        got = jax.block_until_ready(
            colbert_forward(hidden_q, hidden_d, W, doc_input_ids,
                            doc_attn_mask, metric))
        want = ref_forward(hq_f32, hd_f32, w_f32, doc_input_ids,
                           doc_attn_mask, metric)
        if got.shape != (B,) or not jnp.allclose(got, want, rtol=2e-3, atol=2e-3):
            ok = False

    if ok:
        print("KERNEL_OK")
</pallas_src>

<mosaic_0001>
module attributes {stable_mosaic.version = 11 : i64} {
  func.func @_colbert_kernel_cosine(%arg0: i32, %arg1: memref<16x768xbf16, #tpu.memory_space<vmem>>, %arg2: memref<32x768xbf16, #tpu.memory_space<vmem>>, %arg3: memref<768x128xbf16, #tpu.memory_space<vmem>>, %arg4: memref<2x1x16xi32, #tpu.memory_space<vmem>>, %arg5: memref<2x1x128xf32, #tpu.memory_space<vmem>>) attributes {dimension_semantics = [#tpu.dimension_semantics<parallel>], iteration_bounds = array<i64: 1>, scalar_prefetch = 0 : i64, scratch_operands = 0 : i64, tpu.core_type = #tpu.core_type<tc>, window_params = [{transform_indices = @transform_0, window_bounds = array<i64: 16, 768>}, {transform_indices = @transform_1, window_bounds = array<i64: 32, 768>}, {pipeline_mode = #tpu.pipeline_mode<synchronous>, transform_indices = @transform_2, window_bounds = array<i64: 768, 128>}, {transform_indices = @transform_3, window_bounds = array<i64: 2, 1, 16>}, {transform_indices = @transform_4, window_bounds = array<i64: 2, 1, 128>}]} {
    %c0 = arith.constant 0 : index
    %c0_0 = arith.constant 0 : index
    %0 = vector.load %arg3[%c0, %c0_0] : memref<768x128xbf16, #tpu.memory_space<vmem>>, vector<768x128xbf16>
    %c0_1 = arith.constant 0 : index
    %c0_2 = arith.constant 0 : index
    %1 = vector.load %arg1[%c0_1, %c0_2] : memref<16x768xbf16, #tpu.memory_space<vmem>>, vector<16x768xbf16>
    %cst = arith.constant dense<0.000000e+00> : vector<16x128xf32>
    %2 = tpu.matmul %1, %0, %cst {dimension_numbers = #tpu.dot_dimension_numbers<[1], [0], [0], [1], [0, 0, 1, 1], [], []>} : vector<16x768xbf16>, vector<768x128xbf16>, vector<16x128xf32> -> vector<16x128xf32>
    %c0_3 = arith.constant 0 : index
    %c0_4 = arith.constant 0 : index
    %3 = vector.load %arg2[%c0_3, %c0_4] : memref<32x768xbf16, #tpu.memory_space<vmem>>, vector<32x768xbf16>
    %cst_5 = arith.constant dense<0.000000e+00> : vector<32x128xf32>
    %4 = tpu.matmul %3, %0, %cst_5 {dimension_numbers = #tpu.dot_dimension_numbers<[1], [0], [0], [1], [0, 0, 1, 1], [], []>} : vector<32x768xbf16>, vector<768x128xbf16>, vector<32x128xf32> -> vector<32x128xf32>
    %5 = arith.mulf %2, %2 : vector<16x128xf32>
    %cst_6 = arith.constant dense<0.000000e+00> : vector<16xf32>
    %6 = vector.multi_reduction <add>, %5, %cst_6 [1] : vector<16x128xf32> to vector<16xf32>
    %7 = vector.shape_cast %6 : vector<16xf32> to vector<16x1xf32>
    %cst_7 = arith.constant 1.000000e-24 : f32
    %8 = vector.broadcast %cst_7 : f32 to vector<16x1xf32>
    %9 = arith.maximumf %7, %8 : vector<16x1xf32>
    %10 = math.rsqrt %9 : vector<16x1xf32>
    %11 = vector.broadcast %10 : vector<16x1xf32> to vector<16x128xf32>
    %12 = arith.mulf %2, %11 : vector<16x128xf32>
    %13 = arith.mulf %4, %4 : vector<32x128xf32>
    %cst_8 = arith.constant dense<0.000000e+00> : vector<32xf32>
    %14 = vector.multi_reduction <add>, %13, %cst_8 [1] : vector<32x128xf32> to vector<32xf32>
    %15 = vector.shape_cast %14 : vector<32xf32> to vector<32x1xf32>
    %cst_9 = arith.constant 1.000000e-24 : f32
    %16 = vector.broadcast %cst_9 : f32 to vector<32x1xf32>
    %17 = arith.maximumf %15, %16 : vector<32x1xf32>
    %18 = math.rsqrt %17 : vector<32x1xf32>
    %19 = vector.broadcast %18 : vector<32x1xf32> to vector<32x128xf32>
    %20 = arith.mulf %4, %19 : vector<32x128xf32>
    %21 = vector.shape_cast %12 : vector<16x128xf32> to vector<2x8x128xf32>
    %22 = vector.shape_cast %20 : vector<32x128xf32> to vector<2x16x128xf32>
    "tpu.trace_start"() <{level = 10 : i32, message = "bqd,bkd->bqk"}> : () -> ()
    %cst_10 = arith.constant dense<0.000000e+00> : vector<2x8x16xf32>
    %23 = tpu.matmul %21, %22, %cst_10 {dimension_numbers = #tpu.dot_dimension_numbers<[2], [2], [1], [1], [0, 0, 0, 1, 1, 1], [0], [0]>} : vector<2x8x128xf32>, vector<2x16x128xf32>, vector<2x8x16xf32> -> vector<2x8x16xf32>
    "tpu.trace_stop"() : () -> ()
    %c0_11 = arith.constant 0 : index
    %c0_12 = arith.constant 0 : index
    %c0_13 = arith.constant 0 : index
    %24 = vector.load %arg4[%c0_11, %c0_12, %c0_13] : memref<2x1x16xi32, #tpu.memory_space<vmem>>, vector<2x1x16xi32>
    %c0_i32 = arith.constant 0 : i32
    %25 = vector.broadcast %c0_i32 : i32 to vector<2x1x16xi32>
    %26 = arith.cmpi ne, %24, %25 : vector<2x1x16xi32>
    %27 = arith.extui %26 : vector<2x1x16xi1> to vector<2x1x16xi32>
    %28 = arith.sitofp %27 : vector<2x1x16xi32> to vector<2x1x16xf32>
    %29 = vector.broadcast %28 : vector<2x1x16xf32> to vector<2x8x16xf32>
    %30 = arith.mulf %23, %29 : vector<2x8x16xf32>
    %cst_14 = arith.constant dense<0xFF800000> : vector<2x8xf32>
    %31 = vector.multi_reduction <maximumf>, %30, %cst_14 [2] : vector<2x8x16xf32> to vector<2x8xf32>
    %cst_15 = arith.constant dense<0.000000e+00> : vector<2xf32>
    %32 = vector.multi_reduction <add>, %31, %cst_15 [1] : vector<2x8xf32> to vector<2xf32>
    %33 = vector.shape_cast %32 : vector<2xf32> to vector<2x1xf32>
    %34 = vector.shape_cast %33 : vector<2x1xf32> to vector<2x1x1xf32>
    %35 = vector.shape_cast %34 : vector<2x1x1xf32> to vector<2x1x1xf32>
    %36 = vector.broadcast %35 : vector<2x1x1xf32> to vector<2x1x128xf32>
    %c0_16 = arith.constant 0 : index
    %c0_17 = arith.constant 0 : index
    %c0_18 = arith.constant 0 : index
    %37 = vector.load %arg5[%c0_16, %c0_17, %c0_18] : memref<2x1x128xf32, #tpu.memory_space<vmem>>, vector<2x1x128xf32>
    tpu.vector_store %arg5[%c0_16, %c0_17, %c0_18], %36 {strides = array<i32>} : memref<2x1x128xf32, #tpu.memory_space<vmem>>, vector<2x1x128xf32>,
    return
  }
  func.func @transform_0(%arg0: i32) -> (i32, i32) {
    %c0_i32 = arith.constant 0 : i32
    %c0_i32_0 = arith.constant 0 : i32
    return %arg0, %c0_i32 : i32, i32
  }
  func.func @transform_1(%arg0: i32) -> (i32, i32) {
    %c0_i32 = arith.constant 0 : i32
    %c0_i32_0 = arith.constant 0 : i32
    return %arg0, %c0_i32 : i32, i32
  }
  func.func @transform_2(%arg0: i32) -> (i32, i32) {
    %c0_i32 = arith.constant 0 : i32
    %c0_i32_0 = arith.constant 0 : i32
    %c0_i32_1 = arith.constant 0 : i32
    return %c0_i32, %c0_i32_0 : i32, i32
  }
  func.func @transform_3(%arg0: i32) -> (i32, i32, i32) {
    %c0_i32 = arith.constant 0 : i32
    %c0_i32_0 = arith.constant 0 : i32
    %c0_i32_1 = arith.constant 0 : i32
    return %arg0, %c0_i32, %c0_i32_0 : i32, i32, i32
  }
  func.func @transform_4(%arg0: i32) -> (i32, i32, i32) {
    %c0_i32 = arith.constant 0 : i32
    %c0_i32_0 = arith.constant 0 : i32
    %c0_i32_1 = arith.constant 0 : i32
    return %arg0, %c0_i32, %c0_i32_0 : i32, i32, i32
  }
}

</mosaic_0001>

<bundles_post_ra>
// kernel: tpu_custom_call.1
= control target key start
LH: loop header
LB: loop body
LE: loop exit
PB: predicated region body
PF: predicated region fallthrough
CT: control target
= control target key end

     0   :  { %9 = vsyncpa [#allocation3], 0  ;;  %s1686_s0 = inlined_call_operand.hbm [shape: bf16[16,768], index: 0, kind: input, shape index: {}]   ;;  %s1687_s1 = inlined_call_operand.hbm [shape: bf16[32,768], index: 1, kind: input, shape index: {}]   ;;  %s1688_s2 = inlined_call_operand.hbm [shape: bf16[768,128], index: 2, kind: input, shape index: {}]   ;;  %s1689_s3 = inlined_call_operand.vmem [shape: s32[2,1,16], index: 3, kind: input, shape index: {}]   ;;  %s1690_s4 = inlined_call_operand.hbm [shape: f32[2,1,128], index: 4, kind: output, shape index: {}]  }
   0x1   :  { %10 = vsyncpa [#allocation6], 0 }
   0x2   :  { %11 = vsyncpa [#allocation4], 0  ;;  %s29_s17 = sshll.u32 %s1687_s1, 4  ;;  %s1405_s18 = smov [#allocation5]   ;;  %s30_s17 = int_to_ptr.hbm [resolvable:$true] %s29_s17 }
   0x3   :  { %s31_s19 = sshll.u32 %s1405_s18, 4  ;;  %s16_s22 = sshll.u32 %s1686_s0, 4  ;;  %s32_s19 = int_to_ptr.vmem [resolvable:$true] %s31_s19  ;;  %s17_s22 = int_to_ptr.hbm [resolvable:$true] %s16_s22 }
   0x4   :  { %s1406_s23 = smov 384   ;;  %s1407_s24 = smov 24  }
   0x5   :  { %37 = dma.hbm_to_vmem [thread:$0]  %s30_s17, 1536, %s32_s19, [#allocation6], %s1406_s23, %s1406_s23, %s1407_s24  }
   0x6   :  { %s1408_s25 = smov [#allocation2]   ;;  %s42_s29 = sshll.u32 %s1688_s2, 4  ;;  %s43_s29 = int_to_ptr.hbm [resolvable:$true] %s42_s29 }
   0x7   :  { %s18_s26 = sshll.u32 %s1408_s25, 4  ;;  %s1409_s1 = smov [#allocation7]   ;;  %s19_s26 = int_to_ptr.vmem [resolvable:$true] %s18_s26 }
   0x8   :  { %24 = dma.hbm_to_vmem [thread:$0]  %s17_s22, 768, %s19_s26, [#allocation3], %s1406_s23, %s1406_s23, %s1407_s24  }
   0x9   :  { %s44_s30 = sshll.u32 %s1409_s1, 4  ;;  %s1410_s5 = smov 64   ;;  %s45_s30 = int_to_ptr.vmem [resolvable:$true] %s44_s30 }
   0xa   :  { %s1411_s6 = smov 4  }
   0xb   :  { %50 = dma.hbm_to_vmem [thread:$0]  %s43_s29, 6144, %s45_s30, [#allocation6], %s1410_s5, %s1410_s5, %s1411_s6  }
   0xc   :  { %1399 = dma.done.wait [#allocation3], 768  }
   0xd   :  { %1400 = vsyncadd [#allocation3], 4294966528 }
   0xe   :  { %1401 = dma.done.wait [#allocation6], 7680  }
   0xf   :  { %1402 = vsyncadd [#allocation6], 4294959616  ;;  %v1450_v0 = vld [vmem:[#allocation7 + $0x38] sm:$0xff]  ;;  %v1460_v4 = vld [vmem:[#allocation7 + $0x30] sm:$0xff]  ;;  %s1413_s9 = smov [#allocation8]   ;;  %s934_s12 = sshll.u32 %s1690_s4, 4  ;;  %s935_s12 = int_to_ptr.hbm [resolvable:$true] %s934_s12 }
  0x10   :  { %v1452_v1 = vld [vmem:[#allocation7 + $0x78] sm:$0xff]  ;;  %485 = vmatpush.bf16.msra.mxu0 %v1450_v0  ;;  %v1462_v5 = vld [vmem:[#allocation7 + $0x70] sm:$0xff]  ;;  %v1472_v8 = vld [vmem:[#allocation7 + $0x28] sm:$0xff]  ;;  %s1414_s13 = smov 16   ;;  %s1415_s14 = smov 1  }
  0x11   :  { %v1454_v2 = vld [vmem:[#allocation7 + $0xb8] sm:$0xff]  ;;  %499 = vmatpush.bf16.msra.mxu1 %v1452_v1  ;;  %v1466_v6 = vld [vmem:[#allocation7 + $0xb0] sm:$0xff]  ;;  %v1474_v9 = vld [vmem:[#allocation7 + $0x68] sm:$0xff] }
  0x12   :  { %v1456_v3 = vld [vmem:[#allocation7 + $0xf8] sm:$0xff]  ;;  %513 = vmatpush.bf16.msra.mxu2 %v1454_v2  ;;  %v1468_v7 = vld [vmem:[#allocation7 + $0xf0] sm:$0xff]  ;;  %v1478_v10 = vld [vmem:[#allocation7 + $0xa8] sm:$0xff] }
  0x13   :  { %527 = vmatpush.bf16.msra.mxu3 %v1456_v3  ;;  %v1480_v11 = vld [vmem:[#allocation7 + $0xe8] sm:$0xff]  ;;  %v1484_v12 = vld [vmem:[#allocation7 + $0x20] sm:$0xff]  ;;  %v1496_v16 = vld [vmem:[#allocation7 + $0x18] sm:$0xff] }
  0x14   :  { %486 = vmatpush.bf16.msra.mxu0 %v1460_v4  ;;  %v1486_v13 = vld [vmem:[#allocation7 + $0x60] sm:$0xff]  ;;  %v1498_v17 = vld [vmem:[#allocation7 + $0x58] sm:$0xff]  ;;  %v1508_v20 = vld [vmem:[#allocation7 + $0x10] sm:$0xff] }
  0x15   :  { %500 = vmatpush.bf16.msra.mxu1 %v1462_v5  ;;  %v1490_v14 = vld [vmem:[#allocation7 + $0xa0] sm:$0xff]  ;;  %v1502_v18 = vld [vmem:[#allocation7 + $0x98] sm:$0xff]  ;;  %v1510_v21 = vld [vmem:[#allocation7 + $0x50] sm:$0xff] }
  0x16   :  { %514 = vmatpush.bf16.msra.mxu2 %v1466_v6  ;;  %v1492_v15 = vld [vmem:[#allocation7 + $0xe0] sm:$0xff]  ;;  %v1504_v19 = vld [vmem:[#allocation7 + $0xd8] sm:$0xff]  ;;  %v1514_v22 = vld [vmem:[#allocation7 + $0x90] sm:$0xff] }
  0x17   :  { %528 = vmatpush.bf16.msra.mxu3 %v1468_v7  ;;  %v1516_v23 = vld [vmem:[#allocation7 + $0xd0] sm:$0xff]  ;;  %v1520_v24 = vld [vmem:[#allocation7 + $0x8] sm:$0xff]  ;;  %v1530_v28 = vld [vmem:[#allocation7] sm:$0xff] }
  0x18   :  { %487 = vmatpush.bf16.msra.mxu0 %v1472_v8  ;;  %v1522_v25 = vld [vmem:[#allocation7 + $0x48] sm:$0xff]  ;;  %v1532_v29 = vld [vmem:[#allocation7 + $0x40] sm:$0xff]  ;;  %v1540_v32 = vld [vmem:[#allocation7 + $0x138] sm:$0xff] }
  0x19   :  { %501 = vmatpush.bf16.msra.mxu1 %v1474_v9  ;;  %v1526_v26 = vld [vmem:[#allocation7 + $0x88] sm:$0xff]  ;;  %v1534_v30 = vld [vmem:[#allocation7 + $0x80] sm:$0xff]  ;;  %v1542_v33 = vld [vmem:[#allocation7 + $0x178] sm:$0xff] }
  0x1a   :  { %515 = vmatpush.bf16.msra.mxu2 %v1478_v10  ;;  %v1528_v27 = vld [vmem:[#allocation7 + $0xc8] sm:$0xff]  ;;  %v1536_v31 = vld [vmem:[#allocation7 + $0xc0] sm:$0xff]  ;;  %v958_v34 = vld [vmem:[#allocation2 + $0x8] sm:$0xf] }
  0x1b   :  { %529 = vmatpush.bf16.msra.mxu3 %v1480_v11  ;;  %v1266_v35 = vld [vmem:[#allocation2 + $0x1c] sm:$0xf0]  ;;  %v1263_v36 = vld [vmem:[#allocation2 + $0xc] sm:$0xf]  ;;  %v960_v37 = vld [vmem:[#allocation2 + $0x20] sm:$0xf0] }
  0x1c   :  { %488 = vmatpush.bf16.msra.mxu0 %v1484_v12  ;;  %v950_v38 = vld [vmem:[#allocation2] sm:$0xf]  ;;  %v1265_v39 = vld [vmem:[#allocation2 + $0x14] sm:$0xf0]  ;;  %v1262_v40 = vld [vmem:[#allocation2 + $0x4] sm:$0xf]  ;;  %v959_v42 = vor.u32 %v1266_v35, %v958_v34  ;;  %v963_v43 = vor.u32 %v1263_v36, %v960_v37 }
  0x1d   :  { %502 = vmatpush.bf16.msra.mxu1 %v1486_v13  ;;  %v952_v41 = vld [vmem:[#allocation2 + $0x18] sm:$0xf0]  ;;  %v951_v44 = vor.u32 %v1265_v39, %v950_v38  ;;  %v1552_v46 = vld [vmem:[#allocation7 + $0x130] sm:$0xff]  ;;  %v1568_v50 = vld [vmem:[#allocation7 + $0x120] sm:$0xff] }
  0x1e   :  { %516 = vmatpush.bf16.msra.mxu2 %v1490_v14  ;;  %v955_v45 = vor.u32 %v1262_v40, %v952_v41  ;;  %v1554_v47 = vld [vmem:[#allocation7 + $0x170] sm:$0xff]  ;;  %v1560_v48 = vld [vmem:[#allocation7 + $0x128] sm:$0xff]  ;;  %v1570_v51 = vld [vmem:[#allocation7 + $0x160] sm:$0xff] }
  0x1f   :  { %530 = vmatpush.bf16.msra.mxu3 %v1492_v15  ;;  %v1562_v49 = vld [vmem:[#allocation7 + $0x168] sm:$0xff]  ;;  %v1576_v52 = vld [vmem:[#allocation7 + $0x118] sm:$0xff]  ;;  %v1584_v54 = vld [vmem:[#allocation7 + $0x110] sm:$0xff] }
  0x20   :  { %489 = vmatpush.bf16.msra.mxu0 %v1496_v16  ;;  %v1578_v53 = vld [vmem:[#allocation7 + $0x158] sm:$0xff]  ;;  %v1586_v55 = vld [vmem:[#allocation7 + $0x150] sm:$0xff]  ;;  %v1592_v56 = vld [vmem:[#allocation7 + $0x108] sm:$0xff] }
  0x21   :  { %503 = vmatpush.bf16.msra.mxu1 %v1498_v17  ;;  %v1594_v57 = vld [vmem:[#allocation7 + $0x148] sm:$0xff]  ;;  %v1598_v58 = vld [vmem:[#allocation7 + $0x100] sm:$0xff]  ;;  %v1267_v61 = vld [vmem:[#allocation2 + $0x24] sm:$0xf0] }
  0x22   :  { %517 = vmatpush.bf16.msra.mxu2 %v1502_v18  ;;  %v1600_v59 = vld [vmem:[#allocation7 + $0x140] sm:$0xff]  ;;  %v1271_v63 = vld [vmem:[#allocation5 + $0x14] sm:$0xf0]  ;;  %v1208_v35 = vld [vmem:[#allocation5 + $0x58] sm:$0xf0] }
  0x23   :  { %531 = vmatpush.bf16.msra.mxu3 %v1504_v19  ;;  %v966_v60 = vld [vmem:[#allocation2 + $0x10] sm:$0xf]  ;;  %v1276_v34 = vld [vmem:[#allocation5 + $0x44] sm:$0xf] }
  0x24   :  { %490 = vmatpush.bf16.msra.mxu0 %v1508_v20  ;;  %v1166_v62 = vld [vmem:[#allocation5] sm:$0xf]  ;;  %v1211_v37 = vor.u32 %v1276_v34, %v1208_v35 }
  0x25   :  { %504 = vmatpush.bf16.msra.mxu1 %v1510_v21 }
  0x26   :  { %518 = vmatpush.bf16.msra.mxu2 %v1514_v22 }
  0x27   :  { %532 = vmatpush.bf16.msra.mxu3 %v1516_v23 }
  0x28   :  { %491 = vmatpush.bf16.msra.mxu0 %v1520_v24 }
  0x29   :  { %505 = vmatpush.bf16.msra.mxu1 %v1522_v25 }
  0x2a   :  { %519 = vmatpush.bf16.msra.mxu2 %v1526_v26 }
  0x2b   :  { %533 = vmatpush.bf16.msra.mxu3 %v1528_v27 }
  0x2c   :  { %492 = vmatpush.bf16.msra.mxu0 %v1530_v28 }
  0x2d   :  { %506 = vmatpush.bf16.msra.mxu1 %v1532_v29 }
  0x2e   :  { %520 = vmatpush.bf16.msra.mxu2 %v1534_v30 }
  0x2f   :  { %534 = vmatpush.bf16.msra.mxu3 %v1536_v31  ;;  %493 = vmatmul.bf16.vlgmr.msra.gmra.mxu0 %v951_v44 }
  0x30   :  { %541 = vmatpush.bf16.msrb.mxu0 %v1540_v32  ;;  %507 = vmatmul.bf16.vlgmr.msra.gmra.mxu1 %v955_v45 }
  0x31   :  { %555 = vmatpush.bf16.msrb.mxu1 %v1542_v33  ;;  %521 = vmatmul.bf16.vlgmr.msra.gmra.mxu2 %v959_v42 }
  0x32   :  { %641 = vmatpush.bf16.msrb.mxu2 %v1450_v0  ;;  %535 = vmatmul.bf16.vlgmr.msra.gmra.mxu3 %v963_v43  ;;  %v1268_v0 = vld [vmem:[#allocation5 + $0x4] sm:$0xf] }
  0x33   :  { %660 = vmatpush.bf16.msrb.mxu3 %v1452_v1  ;;  %v1168_v1 = vld [vmem:[#allocation5 + $0x18] sm:$0xf0] }
  0x34   :  { %542 = vmatpush.bf16.msrb.mxu0 %v1552_v46 }
  0x35   :  { %556 = vmatpush.bf16.msrb.mxu1 %v1554_v47 }
  0x36   :  { %642 = vmatpush.bf16.msrb.mxu2 %v1460_v4  ;;  %v1264_v4 = vld [vmem:[#allocation2 + $0x14] sm:$0xf] }
  0x37   :  { %661 = vmatpush.bf16.msrb.mxu3 %v1462_v5  ;;  %v968_v5 = vld [vmem:[#allocation2 + $0x28] sm:$0xf0] }
  0x38   :  { %543 = vmatpush.bf16.msrb.mxu0 %v1560_v48 }
  0x39   :  { %557 = vmatpush.bf16.msrb.mxu1 %v1562_v49 }
  0x3a   :  { %643 = vmatpush.bf16.msrb.mxu2 %v1472_v8  ;;  %v967_v8 = vor.u32 %v1267_v61, %v966_v60 }
  0x3b   :  { %662 = vmatpush.bf16.msrb.mxu3 %v1474_v9  ;;  %v1167_v9 = vor.u32 %v1271_v63, %v1166_v62 }
  0x3c   :  { %544 = vmatpush.bf16.msrb.mxu0 %v1568_v50 }
  0x3d   :  { %558 = vmatpush.bf16.msrb.mxu1 %v1570_v51 }
  0x3e   :  { %644 = vmatpush.bf16.msrb.mxu2 %v1484_v12  ;;  %v1171_v12 = vor.u32 %v1268_v0, %v1168_v1 }
  0x3f   :  { %663 = vmatpush.bf16.msrb.mxu3 %v1486_v13  ;;  %v971_v13 = vor.u32 %v1264_v4, %v968_v5 }
  0x40   :  { %545 = vmatpush.bf16.msrb.mxu0 %v1576_v52 }
  0x41   :  { %559 = vmatpush.bf16.msrb.mxu1 %v1578_v53 }
  0x42   :  { %645 = vmatpush.bf16.msrb.mxu2 %v1496_v16  ;;  %v1274_v16 = vld [vmem:[#allocation5 + $0x34] sm:$0xf] }
  0x43   :  { %664 = vmatpush.bf16.msrb.mxu3 %v1498_v17  ;;  %v1192_v17 = vld [vmem:[#allocation5 + $0x48] sm:$0xf0] }
  0x44   :  { %546 = vmatpush.bf16.msrb.mxu0 %v1584_v54 }
  0x45   :  { %560 = vmatpush.bf16.msrb.mxu1 %v1586_v55 }
  0x46   :  { %646 = vmatpush.bf16.msrb.mxu2 %v1508_v20  ;;  %v1182_v20 = vld [vmem:[#allocation5 + $0x10] sm:$0xf] }
  0x47   :  { %665 = vmatpush.bf16.msrb.mxu3 %v1510_v21  ;;  %v1273_v21 = vld [vmem:[#allocation5 + $0x24] sm:$0xf0] }
  0x48   :  { %547 = vmatpush.bf16.msrb.mxu0 %v1592_v56 }
  0x49   :  { %561 = vmatpush.bf16.msrb.mxu1 %v1594_v57 }
  0x4a   :  { %647 = vmatpush.bf16.msrb.mxu2 %v1520_v24  ;;  %v1183_v24 = vor.u32 %v1273_v21, %v1182_v20 }
  0x4b   :  { %666 = vmatpush.bf16.msrb.mxu3 %v1522_v25 }
  0x4c   :  { %548 = vmatpush.bf16.msrb.mxu0 %v1598_v58 }
  0x4d   :  { %562 = vmatpush.bf16.msrb.mxu1 %v1600_v59 }
  0x4e   :  { %648 = vmatpush.bf16.msrb.mxu2 %v1530_v28  ;;  %v1275_v28 = vld [vmem:[#allocation5 + $0x3c] sm:$0xf] }
  0x4f   :  { %667 = vmatpush.bf16.msrb.mxu3 %v1532_v29  ;;  %549 = vmatmul.bf16.vlgmr.msrb.gmra.mxu0 %v967_v8  ;;  %v1200_v29 = vld [vmem:[#allocation5 + $0x50] sm:$0xf0] }
  0x50   :  { %679 = vmatpush.bf16.msra.mxu0 %v1454_v2  ;;  %563 = vmatmul.bf16.vlgmr.msrb.gmra.mxu1 %v971_v13  ;;  %v1190_v2 = vld [vmem:[#allocation5 + $0x30] sm:$0xf] }
  0x51   :  { %698 = vmatpush.bf16.msra.mxu1 %v1456_v3  ;;  %649 = vmatmul.bf16.vlgmr.msrb.gmra.mxu2 %v1167_v9  ;;  %v1277_v3 = vld [vmem:[#allocation5 + $0x44] sm:$0xf0] }
  0x52   :  { %717 = vmatpush.bf16.msra.mxu2 %v1540_v32  ;;  %668 = vmatmul.bf16.vlgmr.msrb.gmra.mxu3 %v1171_v12 }
  0x53   :  { %736 = vmatpush.bf16.msra.mxu3 %v1542_v33  ;;  %v1206_v33 = vld [vmem:[#allocation5 + $0x40] sm:$0xf] }
  0x54   :  { %680 = vmatpush.bf16.msra.mxu0 %v1466_v6  ;;  %v1191_v6 = vor.u32 %v1277_v3, %v1190_v2 }
  0x55   :  { %699 = vmatpush.bf16.msra.mxu1 %v1468_v7  ;;  %v1195_v7 = vor.u32 %v1274_v16, %v1192_v17 }
  0x56   :  { %718 = vmatpush.bf16.msra.mxu2 %v1552_v46 }
  0x57   :  { %737 = vmatpush.bf16.msra.mxu3 %v1554_v47 }
  0x58   :  { %681 = vmatpush.bf16.msra.mxu0 %v1478_v10  ;;  %v1174_v10 = vld [vmem:[#allocation5 + $0x8] sm:$0xf] }
  0x59   :  { %700 = vmatpush.bf16.msra.mxu1 %v1480_v11  ;;  %v1272_v11 = vld [vmem:[#allocation5 + $0x1c] sm:$0xf0] }
  0x5a   :  { %719 = vmatpush.bf16.msra.mxu2 %v1560_v48 }
  0x5b   :  { %738 = vmatpush.bf16.msra.mxu3 %v1562_v49 }
  0x5c   :  { %682 = vmatpush.bf16.msra.mxu0 %v1490_v14  ;;  %v1269_v14 = vld [vmem:[#allocation5 + $0xc] sm:$0xf] }
  0x5d   :  { %701 = vmatpush.bf16.msra.mxu1 %v1492_v15  ;;  %v1176_v15 = vld [vmem:[#allocation5 + $0x20] sm:$0xf0] }
  0x5e   :  { %720 = vmatpush.bf16.msra.mxu2 %v1568_v50 }
  0x5f   :  { %739 = vmatpush.bf16.msra.mxu3 %v1570_v51 }
  0x60   :  { %683 = vmatpush.bf16.msra.mxu0 %v1502_v18  ;;  %v1175_v18 = vor.u32 %v1272_v11, %v1174_v10 }
  0x61   :  { %702 = vmatpush.bf16.msra.mxu1 %v1504_v19  ;;  %654 = vmatmul.bf16.gmra.mxu2 %v1191_v6  ;;  %v1179_v19 = vor.u32 %v1269_v14, %v1176_v15 }
  0x62   :  { %721 = vmatpush.bf16.msra.mxu2 %v1576_v52  ;;  %673 = vmatmul.bf16.gmra.mxu3 %v1195_v7 }
  0x63   :  { %740 = vmatpush.bf16.msra.mxu3 %v1578_v53 }
  0x64   :  { %684 = vmatpush.bf16.msra.mxu0 %v1514_v22  ;;  %v1270_v22 = vld [vmem:[#allocation5 + $0x14] sm:$0xf] }
  0x65   :  { %703 = vmatpush.bf16.msra.mxu1 %v1516_v23  ;;  %v1184_v23 = vld [vmem:[#allocation5 + $0x28] sm:$0xf0] }
  0x66   :  { %722 = vmatpush.bf16.msra.mxu2 %v1584_v54  ;;  %v1187_v25 = vor.u32 %v1270_v22, %v1184_v23 }
  0x67   :  { %741 = vmatpush.bf16.msra.mxu3 %v1586_v55 }
  0x68   :  { %685 = vmatpush.bf16.msra.mxu0 %v1526_v26  ;;  %v1198_v26 = vld [vmem:[#allocation5 + $0x38] sm:$0xf] }
  0x69   :  { %704 = vmatpush.bf16.msra.mxu1 %v1528_v27  ;;  %v1278_v27 = vld [vmem:[#allocation5 + $0x4c] sm:$0xf0] }
  0x6a   :  { %723 = vmatpush.bf16.msra.mxu2 %v1592_v56  ;;  %v1199_v32 = vor.u32 %v1278_v27, %v1198_v26 }
  0x6b   :  { %742 = vmatpush.bf16.msra.mxu3 %v1594_v57 }
  0x6c   :  { %686 = vmatpush.bf16.msra.mxu0 %v1534_v30  ;;  %v1203_v30 = vor.u32 %v1275_v28, %v1200_v29 }
  0x6d   :  { %705 = vmatpush.bf16.msra.mxu1 %v1536_v31  ;;  %v1279_v31 = vld [vmem:[#allocation5 + $0x54] sm:$0xf0] }
  0x6e   :  { %724 = vmatpush.bf16.msra.mxu2 %v1598_v58  ;;  %v1207_v36 = vor.u32 %v1279_v31, %v1206_v33 }
  0x6f   :  { %687 = vmatmul.bf16.vlgmr.msra.gmra.mxu0 %v1175_v18  ;;  %743 = vmatpush.bf16.msra.mxu3 %v1600_v59 }
  0x70   :  { %706 = vmatmul.bf16.vlgmr.msra.gmra.mxu1 %v1179_v19 }
  0x71   :  { %725 = vmatmul.bf16.vlgmr.msra.gmra.mxu2 %v1183_v24 }
  0x72   :  { %744 = vmatmul.bf16.vlgmr.msra.gmra.mxu3 %v1187_v25 }
  0x7f   :  { %692 = vmatmul.bf16.gmra.mxu0 %v1199_v32 }
  0x80   :  { %711 = vmatmul.bf16.gmra.mxu1 %v1203_v30 }
  0x81   :  { %730 = vmatmul.bf16.gmra.mxu2 %v1207_v36 }
  0x82   :  { %749 = vmatmul.bf16.gmra.mxu3 %v1211_v37 }
  0xac   :  { %v494_v38 = vpop.f32.mrf.mxu0 }
  0xad   :  { %v508_v39 = vpop.f32.mrf.mxu1 }
  0xae   :  { %v509_v42 = vadd.f32 %v508_v39, %v494_v38 }
  0xb4   :  { %v522_v40 = vpop.f32.mrf.mxu2  ;;  %v496_v43 = vpop.f32.mrf.mxu0 }
  0xb5   :  { %v536_v41 = vpop.f32.mrf.mxu3  ;;  %v510_v44 = vpop.f32.mrf.mxu1  ;;  %v523_v45 = vadd.f32 %v522_v40, %v509_v42 }
  0xb6   :  { %v511_v47 = vadd.f32 %v510_v44, %v496_v43 }
  0xb7   :  { %v537_v46 = vadd.f32 %v536_v41, %v523_v45 }
  0xbc   :  { %v524_v48 = vpop.f32.mrf.mxu2 }
  0xbd   :  { %v538_v49 = vpop.f32.mrf.mxu3  ;;  %v525_v53 = vadd.f32 %v524_v48, %v511_v47 }
  0xbf   :  { %v539_v56 = vadd.f32 %v538_v49, %v525_v53 }
  0xcc   :  { %v550_v50 = vpop.f32.mrf.mxu0 }
  0xcd   :  { %v551_v51 = vadd.f32 %v550_v50, %v537_v46  ;;  %v564_v52 = vpop.f32.mrf.mxu1 }
  0xcf   :  { %v1642_v54 = vadd.f32 %v564_v52, %v551_v51 }
  0xd1   :  { %v755_v55 = vmul.f32 %v1642_v54, %v1642_v54 }
  0xd3   :  { %757 = vadd.xlane.f32.xlu2 %v755_v55 }
  0xd4   :  { %v650_v57 = vpop.f32.mrf.mxu2  ;;  %v552_v59 = vpop.f32.mrf.mxu0 }
  0xd5   :  { %v669_v58 = vpop.f32.mrf.mxu3  ;;  %v553_v60 = vadd.f32 %v552_v59, %v539_v56  ;;  %v566_v61 = vpop.f32.mrf.mxu1 }
  0xd6   :  { %v670_v2 = vadd.f32 %v669_v58, %v650_v57 }
  0xd7   :  { %v1646_v62 = vadd.f32 %v566_v61, %v553_v60 }
  0xd9   :  { %v756_v63 = vmul.f32 %v1646_v62, %v1646_v62 }
  0xdb   :  { %759 = vadd.xlane.f32.xlu2 %v756_v63 }
  0xdc   :  { %v652_v0 = vpop.f32.mrf.mxu2 }
  0xdd   :  { %v671_v1 = vpop.f32.mrf.mxu3 }
  0xde   :  { %v672_v7 = vadd.f32 %v671_v1, %v652_v0 }
  0xe4   :  { %v655_v4 = vpop.f32.mrf.mxu2 }
  0xe5   :  { %v674_v5 = vpop.f32.mrf.mxu3 }
  0xe6   :  { %v675_v23 = vadd.f32 %v674_v5, %v655_v4 }
  0xec   :  { %v688_v8 = vpop.f32.mrf.mxu0  ;;  %v657_v12 = vpop.f32.mrf.mxu2 }
  0xed   :  { %v707_v9 = vpop.f32.mrf.mxu1  ;;  %v676_v13 = vpop.f32.mrf.mxu3  ;;  %v689_v3 = vadd.f32 %v688_v8, %v670_v2 }
  0xee   :  { %v677_v31 = vadd.f32 %v676_v13, %v657_v12 }
  0xef   :  { %v708_v16 = vadd.f32 %v707_v9, %v689_v3 }
  0xf4   :  { %v690_v17 = vpop.f32.mrf.mxu0  ;;  %v726_v6 = vpop.f32.mrf.mxu2 }
  0xf5   :  { %v727_v10 = vadd.f32 %v726_v6, %v708_v16  ;;  %v745_v11 = vpop.f32.mrf.mxu3  ;;  %v709_v14 = vpop.f32.mrf.mxu1  ;;  %v691_v15 = vadd.f32 %v690_v17, %v672_v7 }
  0xf7   :  { %v1650_v18 = vadd.f32 %v745_v11, %v727_v10  ;;  %v710_v20 = vadd.f32 %v709_v14, %v691_v15 }
  0xf9   :  { %v785_v19 = vmul.f32 %v1650_v18, %v1650_v18 }
  0xfb   :  { %789 = vadd.xlane.f32.xlu1 %v785_v19 }
  0xfc   :  { %v693_v21 = vpop.f32.mrf.mxu0  ;;  %v728_v22 = vpop.f32.mrf.mxu2 }
  0xfd   :  { %v729_v24 = vadd.f32 %v728_v22, %v710_v20  ;;  %v747_v25 = vpop.f32.mrf.mxu3  ;;  %v694_v26 = vadd.f32 %v693_v21, %v675_v23  ;;  %v712_v28 = vpop.f32.mrf.mxu1 }
  0xff   :  { %v1654_v27 = vadd.f32 %v747_v25, %v729_v24  ;;  %v713_v32 = vadd.f32 %v712_v28, %v694_v26 }
 0x101   :  { %v786_v29 = vmul.f32 %v1654_v27, %v1654_v27 }
 0x103   :  { %791 = vadd.xlane.f32.xlu0 %v786_v29 }
 0x104   :  { %v695_v30 = vpop.f32.mrf.mxu0  ;;  %v731_v33 = vpop.f32.mrf.mxu2 }
 0x105   :  { %v732_v34 = vadd.f32 %v731_v33, %v713_v32  ;;  %v750_v35 = vpop.f32.mrf.mxu3  ;;  %v696_v36 = vadd.f32 %v695_v30, %v677_v31  ;;  %v714_v39 = vpop.f32.mrf.mxu1 }
 0x107   :  { %v1658_v37 = vadd.f32 %v750_v35, %v732_v34  ;;  %v715_v40 = vadd.f32 %v714_v39, %v696_v36 }
 0x109   :  { %v787_v38 = vmul.f32 %v1658_v37, %v1658_v37 }
 0x10b   :  { %793 = vadd.xlane.f32.xlu1 %v787_v38 }
 0x10c   :  { %v733_v41 = vpop.f32.mrf.mxu2 }
 0x10d   :  { %v734_v42 = vadd.f32 %v733_v41, %v715_v40  ;;  %v752_v43 = vpop.f32.mrf.mxu3 }
 0x10f   :  { %v1662_v44 = vadd.f32 %v752_v43, %v734_v42 }
 0x111   :  { %v788_v45 = vmul.f32 %v1662_v44, %v1662_v44 }
 0x113   :  { %795 = vadd.xlane.f32.xlu0 %v788_v45  ;;  %v885_v45 = vld [vmem:[%s1689_s3] sm:$0x1] }
 0x146   :  { %v758_v46 = vpop.xlane.xlu2 %757 }
 0x147   :  { %v761_v47 = vmax.f32 %v758_v46, 1e-24  ;;  %v1412_v46 = vmov 0.0  }
 0x149   :  { %vm769_vm7 = vweird.f32 %v761_v47 }
 0x14e   :  { %v760_v57 = vpop.xlane.xlu2 %759 }
 0x14f   :  { %v1666_v59 = vmax.f32 %v760_v57, 1e-24 }
 0x16e   :  { %v790_v48 = vpop.xlane.xlu1 %789 }
 0x16f   :  { %v797_v49 = vmax.f32 %v790_v48, 1e-24 }
 0x171   :  { %1291 = vrsqrt.f32 %v797_v49  ;;  %vm807_vm4 = vweird.f32 %v797_v49 }
 0x172   :  { %1293 = vrsqrt.f32 %v761_v47 }
 0x176   :  { %v792_v50 = vpop.xlane.xlu0 %791 }
 0x177   :  { %v1292_v51 = vpop.eup %1291  ;;  %v798_v52 = vmax.f32 %v792_v50, 1e-24 }
 0x178   :  { %v1294_v53 = vpop.eup %1293  ;;  %v802_v55 = vmul.f32 %v1292_v51, %v797_v49  ;;  %vm808_vm1 = vweird.f32 %v1292_v51 }
 0x179   :  { %1295 = vrsqrt.f32 %v798_v52  ;;  %v764_v56 = vmul.f32 %v1294_v53, %v761_v47  ;;  %vm817_vm2 = vweird.f32 %v798_v52  ;;  %vm770_vm5 = vweird.f32 %v1294_v53  ;;  %vm809_vm6 = vmor %vm807_vm4, %vm808_vm1 }
 0x17a   :  { %v803_v58 = vmul.f32 %v1292_v51, %v802_v55  ;;  %vm771_vm8 = vmor %vm769_vm7, %vm770_vm5  ;;  %vm914_vm5 = vcmask 1041409  }
 0x17b   :  { %v765_v63 = vmul.f32 %v1294_v53, %v764_v56  ;;  %v910_v56 = vlaneseq }
 0x17c   :  { %v804_v1 = vmul.f32 0.5, %v803_v58 }
 0x17d   :  { %v766_v8 = vmul.f32 0.5, %v765_v63  ;;  %v911_v57 = vand.u32 127, %v910_v56 }
 0x17e   :  { %v794_v60 = vpop.xlane.xlu1 %793  ;;  %v805_v9 = vsub.f32 1.5, %v804_v1 }
 0x17f   :  { %v1296_v61 = vpop.eup %1295  ;;  %v799_v0 = vmax.f32 %v794_v60, 1e-24  ;;  %v767_v16 = vsub.f32 1.5, %v766_v8 }
 0x180   :  { %v812_v4 = vmul.f32 %v1296_v61, %v798_v52  ;;  %vm818_vm0 = vweird.f32 %v1296_v61  ;;  %v806_v11 = vmul.f32 %v1292_v51, %v805_v9 }
 0x181   :  { %1297 = vrsqrt.f32 %v799_v0  ;;  %vm819_vm3 = vmor %vm817_vm2, %vm818_vm0  ;;  %v768_v15 = vmul.f32 %v1294_v53, %v767_v16  ;;  %vm827_vm13 = vweird.f32 %v799_v0  ;;  %vm779_vm0 = vweird.f32 %v1666_v59 }
 0x182   :  { %1299 = vrsqrt.f32 %v1666_v59  ;;  %v813_v5 = vmul.f32 %v1296_v61, %v812_v4  ;;  %v810_v22 = vsel %vm809_vm6, %v1292_v51, %v806_v11  ;;  %vm887_vm2 = vcmp.ne.s32.totalorder %v885_v45, 0 }
 0x183   :  { %v772_v24 = vsel %vm771_vm8, %v1294_v53, %v768_v15  ;;  %v841_v26 = vmul.f32 %v810_v22, %v1650_v18  ;;  %v1212_v47 = vsel %vm887_vm2, 1.0, %v1412_v46  ;;  %vm917_vm6 = vcmask 58368  }
 0x184   :  { %v814_v12 = vmul.f32 0.5, %v813_v5  ;;  %v783_v30 = vmul.f32 %v772_v24, %v1642_v54 }
 0x186   :  { %v815_v13 = vsub.f32 1.5, %v814_v12  ;;  %v796_v2 = vpop.xlane.xlu0 %795 }
 0x187   :  { %v1298_v3 = vpop.eup %1297  ;;  %v800_v17 = vmax.f32 %v796_v2, 1e-24 }
 0x188   :  { %v1300_v6 = vpop.eup %1299  ;;  %v816_v7 = vmul.f32 %v1296_v61, %v815_v13  ;;  %v822_v10 = vmul.f32 %v1298_v3, %v799_v0  ;;  %vm828_vm10 = vweird.f32 %v1298_v3 }
 0x189   :  { %1301 = vrsqrt.f32 %v800_v17  ;;  %v774_v19 = vmul.f32 %v1300_v6, %v1666_v59  ;;  %vm837_vm11 = vweird.f32 %v800_v17  ;;  %vm780_vm14 = vweird.f32 %v1300_v6  ;;  %vm829_vm15 = vmor %vm827_vm13, %vm828_vm10 }
 0x18a   :  { %v820_v14 = vsel %vm819_vm3, %v1296_v61, %v816_v7  ;;  %v823_v21 = vmul.f32 %v1298_v3, %v822_v10  ;;  %vm781_vm1 = vmor %vm779_vm0, %vm780_vm14  ;;  %vm901_vm3 = vcmask 130048  }
 0x18b   :  { %v842_v20 = vmul.f32 %v820_v14, %v1654_v27  ;;  %v775_v25 = vmul.f32 %v1300_v6, %v774_v19 }
 0x18c   :  { %v824_v28 = vmul.f32 0.5, %v823_v21 }
 0x18d   :  { %859 = vmatpush.xpose.msrb.mxu0 %v842_v20  ;;  %v776_v33 = vmul.f32 0.5, %v775_v25 }
 0x18e   :  { %v825_v31 = vsub.f32 1.5, %v824_v28 }
 0x18f   :  { %v1302_v23 = vpop.eup %1301  ;;  %v777_v35 = vsub.f32 1.5, %v776_v33 }
 0x190   :  { %v832_v29 = vmul.f32 %v1302_v23, %v800_v17  ;;  %vm838_vm9 = vweird.f32 %v1302_v23  ;;  %v826_v38 = vmul.f32 %v1298_v3, %v825_v31 }
 0x191   :  { %860 = vmatpush.xpose.msrb.mxu0 %v841_v26  ;;  %vm839_vm12 = vmor %vm837_vm11, %vm838_vm9  ;;  %v778_v39 = vmul.f32 %v1300_v6, %v777_v35 }
 0x192   :  { %v833_v32 = vmul.f32 %v1302_v23, %v832_v29  ;;  %v830_v54 = vsel %vm829_vm15, %v1298_v3, %v826_v38 }
 0x193   :  { %v782_v41 = vsel %vm781_vm1, %v1300_v6, %v778_v39  ;;  %v843_v42 = vmul.f32 %v830_v54, %v1658_v37  ;;  %v886_v37 = vld [vmem:[%s1689_s3 + $0x1] sm:$0x1]  ;;  %s932_s3 = sshll.u32 %s1413_s9, 4  ;;  %s933_s3 = int_to_ptr.vmem [resolvable:$true] %s932_s3 }
 0x194   :  { %v834_v34 = vmul.f32 0.5, %v833_v32  ;;  %861 = vmatmul.f32.vlgmr.msrb.gmra.mxu0 %v783_v30  ;;  %v784_v43 = vmul.f32 %v782_v41, %v1646_v62  ;;  %vm888_vm4 = vcmp.ne.s32.totalorder %v886_v37, 0 }
 0x195   :  { %v1213_v62 = vsel %vm888_vm4, 1.0, %v1412_v46 }
 0x196   :  { %v835_v27 = vsub.f32 1.5, %v834_v34  ;;  %v896_v51 = vperm.slane %v1213_v62, 0 }
 0x198   :  { %v836_v36 = vmul.f32 %v1302_v23, %v835_v27 }
 0x19a   :  { %v840_v18 = vsel %vm839_vm12, %v1302_v23, %v836_v36 }
 0x19b   :  { %v844_v40 = vmul.f32 %v840_v18, %v1662_v44  ;;  %v895_v44 = vperm.slane %v1212_v47, 0 }
 0x19d   :  { %879 = vmatpush.xpose.msrb.mxu1 %v844_v40 }
 0x1a1   :  { %880 = vmatpush.xpose.msrb.mxu1 %v843_v42 }
 0x1a4   :  { %881 = vmatmul.f32.vlgmr.msrb.gmra.mxu1 %v784_v43 }
 0x211   :  { %v862_v48 = vpop.f32.mrf.mxu0 }
 0x212   :  { %v899_v49 = vmul.f32 %v895_v44, %v862_v48 }
 0x214   :  { %v902_v50 = vsel %vm901_vm3, %v899_v49, -inf }
 0x215   :  { %903 = vmax.xlane.f32.xlu0 %v902_v50 }
 0x221   :  { %v882_v52 = vpop.f32.mrf.mxu1 }
 0x222   :  { %v900_v53 = vmul.f32 %v896_v51, %v882_v52 }
 0x224   :  { %v905_v55 = vsel %vm901_vm3, %v900_v53, -inf }
 0x225   :  { %906 = vmax.xlane.f32.xlu1 %v905_v55 }
 0x288   :  { %v904_v58 = vpop.xlane.xlu0 %903 }
 0x289   :  { %v912_v60 = vperm.slane %v904_v58, %v911_v57 }
 0x298   :  { %v907_v59 = vpop.xlane.xlu1 %906 }
 0x299   :  { %v913_v61 = vperm.slane %v907_v59, %v911_v57 }
 0x29b   :  { %v915_v63 = vsel %vm914_vm5, %v913_v61, %v912_v60 }
 0x29c   :  { %v918_v0 = vsel %vm917_vm6, %v915_v63, 0.0 }
 0x29d   :  { %919 = vadd.xlane.f32.xlu2 %v918_v0 }
 0x310   :  { %v920_v1 = vpop.xlane.xlu2 %919 }
 0x311   :  { %v922_v4 = vperm.slane %v920_v1, 0  ;;  %v923_v5 = vperm.slane %v920_v1, 1 }
 0x313   :  { %926 = vst [vmem:[#allocation8] sm:$0x1] %v922_v4 }
 0x314   :  { %927 = vst [vmem:[#allocation8 + $0x1] sm:$0x1] %v923_v5 }
 0x315   :  { %940 = dma.vmem_to_hbm [thread:$0]  %s933_s3, 32, %s935_s12, [#allocation4], %s1414_s13, %s1414_s13, %s1415_s14  }
 0x316   :  { %1403 = dma.done.wait [#allocation4], 32  }
 0x317   :  { %1404 = vsyncadd [#allocation4], 4294967264 }
 0x318   :  { %945 = vsyncpa [#allocation3], 1 }
 0x319   :  { %946 = vsyncpa [#allocation6], 1 }
 0x31a   :  { %947 = vsyncpa [#allocation4], 1 }

</bundles_post_ra>
